<compile_context>
chip_gen: v7x
topology: tpu7x:2x2x1
jax: 0.10.0
libtpu: 0.0.40
codegen_flags: <defaults>
</compile_context>

<pallas_src>
import functools

import jax
import jax.numpy as jnp
from jax.experimental import pallas as pl
from jax.experimental.pallas import tpu as pltpu

EPS = 1e-5
_DEFAULT_VMEM = 64 * 1024 * 1024  # conservative fallback = v7x per-TensorCore VMEM


def _round_up(x, m):
    return ((x + m - 1) // m) * m


def _pad2d(x, rows, cols):
    return jnp.pad(x, ((0, rows - x.shape[0]), (0, cols - x.shape[1])))


def _vmem_capacity_bytes():
    try:
        return int(pltpu.get_tpu_info().vmem_capacity_bytes)
    except Exception:
        return _DEFAULT_VMEM


def _vmem_estimate(tm, dp, tn, has_residual):
    """Footprint consistent with default 2-deep pipelining on every stream."""
    est = 2 * tm * dp * 4                      # hidden input stream
    if has_residual:
        est += 2 * tm * dp * 4                 # residual input stream
    est += 2 * tm * tn * 4                     # mixer output stream
    est += 2 * tm * dp * 4                     # residual output stream
    est += 2 * dp * tn * 2                     # bf16 weight (2 buffers, conservative)
    est += 2 * 3 * dp * 4                      # gamma / beta / bias rows
    est += tm * dp * 2                         # cached bf16 post-LN scratch
    return est


def _pick_config(n_rows, dp, has_residual, vmem_cap):
    """Pick (tm, tn) so the footprint fits ~75% of this generation's VMEM."""
    budget = int(vmem_cap * 0.75)              # headroom for compiler-internal scratch
    # Row tile: large (amortizes ~0.35us/step, fills MXU rows) but small enough
    # that the parallel row axis has >= 2 steps (keeps both v7x TCs busy).
    tm_target = min(512, max(8, _round_up(-(-n_rows // 2), 8)))
    tm_cands = [t for t in (tm_target, 256, 128, 64, 32, 16, 8) if t <= tm_target]
    # Column tile: whole-weight residency first (weight DMA'd once, no column
    # grid); otherwise a divisor of Dp so the contraction dim is never inflated.
    tn_cands = [dp] + [t for t in (512, 256, 128) if t < dp and dp % t == 0]
    for tn in tn_cands:
        # Full residency is only worth it if it leaves a reasonable row tile.
        min_tm = min(128, tm_target) if tn == dp else 8
        for tm in tm_cands:
            if tm < min_tm:
                continue
            est = _vmem_estimate(tm, dp, tn, has_residual)
            if est <= budget:
                return tm, tn, est
    tm, tn = tm_cands[-1], tn_cands[-1]
    return tm, tn, _vmem_estimate(tm, dp, tn, has_residual)


def _make_block_kernel(d_real, has_residual):
    """Fused Add + LayerNorm + dense-mixer over one (row tile, weight-col tile)."""

    def kernel(*refs):
        if has_residual:
            (h_ref, r_ref, g_ref, b_ref, w_ref, wb_ref,
             out_ref, resid_ref, y_ref) = refs
        else:
            (h_ref, g_ref, b_ref, w_ref, wb_ref,
             out_ref, resid_ref, y_ref) = refs

        # Add + LayerNorm are identical for every weight-column step: compute
        # once per row tile, cache bf16 post-LN activations in VMEM scratch,
        # and write the residual output once.
        @pl.when(pl.program_id(1) == 0)
        def _():
            if has_residual:
                res = h_ref[...] + r_ref[...]          # fused Add
            else:
                res = h_ref[...]                       # first block: residual = hidden
            resid_ref[...] = res                       # residual_in_fp32 output

            dp = res.shape[-1]
            inv_d = 1.0 / d_real
            mu = jnp.sum(res, axis=-1, keepdims=True) * inv_d
            ctr = res - mu
            if d_real != dp:                           # exclude zero-padded lanes
                col = jax.lax.broadcasted_iota(jnp.int32, res.shape, dimension=1)
                ctr = jnp.where(col < d_real, ctr, 0.0)
            var = jnp.sum(ctr * ctr, axis=-1, keepdims=True) * inv_d
            xhat = ctr * jax.lax.rsqrt(var + EPS)
            y = xhat * g_ref[...] + b_ref[...]
            # TODO(synk): LN output is cast to bf16 for the MXU -> the mixer
            # output carries bf16 activation error (f32 accumulation).
            y_ref[...] = y.astype(jnp.bfloat16)

        # mixer: dense D -> D on the MXU (bf16 x bf16 -> f32 accumulate).
        out_ref[...] = (
            jnp.dot(y_ref[...], w_ref[...], preferred_element_type=jnp.float32)
            + wb_ref[...]
        )

    return kernel


@functools.partial(jax.jit, static_argnames=("has_residual",))
def _block_forward_impl(hidden_states, residual, gamma, beta, w_mix, b_mix,
                        *, has_residual):
    B, L, D = hidden_states.shape
    N = B * L
    Dp = _round_up(D, 128)                     # lane-dense; contraction never inflated past 128 pad

    vmem_cap = _vmem_capacity_bytes()
    tm_eff, tn_eff, vmem_est = _pick_config(N, Dp, has_residual, vmem_cap)
    Np = _round_up(N, tm_eff)

    h2 = _pad2d(hidden_states.reshape(N, D).astype(jnp.float32), Np, Dp)
    operands = [h2]
    if has_residual:
        operands.append(_pad2d(residual.reshape(N, D).astype(jnp.float32), Np, Dp))
    operands += [
        _pad2d(gamma.reshape(1, D).astype(jnp.float32), 1, Dp),
        _pad2d(beta.reshape(1, D).astype(jnp.float32), 1, Dp),
        _pad2d(w_mix.astype(jnp.float32), Dp, Dp).astype(jnp.bfloat16),  # bf16 MXU operand
        _pad2d(b_mix.reshape(1, D).astype(jnp.float32), 1, Dp),
    ]

    grid = (Np // tm_eff, Dp // tn_eff)
    row_map = lambda i, j: (i, 0)
    row_spec = pl.BlockSpec((tm_eff, Dp), row_map)
    bcast_spec = pl.BlockSpec((1, Dp), lambda i, j: (0, 0))
    in_specs = [row_spec] + ([row_spec] if has_residual else []) + [
        bcast_spec,                                        # gamma
        bcast_spec,                                        # beta
        pl.BlockSpec((Dp, tn_eff), lambda i, j: (0, j)),   # weight column tile
        pl.BlockSpec((1, tn_eff), lambda i, j: (0, j)),    # bias column tile
    ]
    out_specs = [
        pl.BlockSpec((tm_eff, tn_eff), lambda i, j: (i, j)),   # mixer output
        row_spec,                                              # residual (written at j == 0)
    ]

    vmem_limit = int(min(vmem_cap, max(int(1.25 * vmem_est), 32 * 1024 * 1024)))

    n_streams = 3 + (1 if has_residual else 0)
    cost = pl.CostEstimate(
        flops=2 * Np * Dp * Dp + 10 * Np * Dp,
        transcendentals=Np,
        bytes_accessed=n_streams * Np * Dp * 4 + grid[0] * Dp * Dp * 2 + 3 * Dp * 4,
    )

    out, resid = pl.pallas_call(
        _make_block_kernel(D, has_residual),
        out_shape=(
            jax.ShapeDtypeStruct((Np, Dp), jnp.float32),
            jax.ShapeDtypeStruct((Np, Dp), jnp.float32),
        ),
        grid_spec=pltpu.PrefetchScalarGridSpec(
            num_scalar_prefetch=0,
            grid=grid,
            in_specs=in_specs,
            out_specs=out_specs,
            scratch_shapes=[pltpu.VMEM((tm_eff, Dp), jnp.bfloat16)],  # cached post-LN bf16
        ),
        compiler_params=pltpu.CompilerParams(
            dimension_semantics=("parallel", "arbitrary"),
            vmem_limit_bytes=vmem_limit,
        ),
        cost_estimate=cost,
    )(*operands)

    # TODO(synk): the [:N, :D] slice copies the padded buffers once per call;
    # stacked Blocks could keep the (Np, Dp) layout between layers instead.
    out = out[:N, :D].reshape(B, L, D)
    resid = resid[:N, :D].reshape(B, L, D)
    return out, resid


def block_forward(hidden_states, residual, gamma, beta, w_mix, b_mix):
    """hidden_states: (B, L, D) f32; residual: (B, L, D) f32 or None (first block)."""
    has_residual = residual is not None
    return _block_forward_impl(hidden_states, residual, gamma, beta, w_mix, b_mix,
                               has_residual=has_residual)


def _reference(hidden_states, residual, gamma, beta, w_mix, b_mix):
    res = hidden_states if residual is None else hidden_states + residual
    mu = jnp.mean(res, axis=-1, keepdims=True)
    var = jnp.mean((res - mu) ** 2, axis=-1, keepdims=True)
    y = (res - mu) / jnp.sqrt(var + EPS) * gamma + beta
    out = jnp.einsum("bld,de->ble", y, w_mix) + b_mix
    return out, res


if __name__ == "__main__":
    B, L, D = 2, 8, 32  # batch=2, seq=8, hidden=32

    key = jax.random.PRNGKey(0)
    k_h, k_r, k_w, k_g, k_b = jax.random.split(key, 5)

    hidden_states = jax.random.normal(k_h, (B, L, D), dtype=jnp.float32)
    residual = jax.random.normal(k_r, (B, L, D), dtype=jnp.float32)

    # Deterministic parameters (LayerNorm affine + dense mixer).
    gamma = 1.0 + 0.1 * jax.random.normal(k_g, (D,), dtype=jnp.float32)
    beta = 0.1 * jax.random.normal(k_b, (D,), dtype=jnp.float32)
    w_mix = jax.random.normal(k_w, (D, D), dtype=jnp.float32) / jnp.sqrt(D)
    b_mix = jnp.zeros((D,), dtype=jnp.float32)

    # Normal block (residual provided).
    out, resid = block_forward(hidden_states, residual, gamma, beta, w_mix, b_mix)
    out, resid = jax.block_until_ready((out, resid))
    ref_out, ref_resid = _reference(hidden_states, residual, gamma, beta, w_mix, b_mix)
    # bf16 MXU operands / f32 accumulation -> slightly looser tolerance on the mixer out.
    assert jnp.allclose(out, ref_out, atol=3e-2, rtol=3e-2)
    assert jnp.allclose(resid, ref_resid, atol=1e-5, rtol=1e-5)

    # First block (residual=None): dedicated kernel variant without the residual stream.
    out0, resid0 = block_forward(hidden_states, None, gamma, beta, w_mix, b_mix)
    out0, resid0 = jax.block_until_ready((out0, resid0))
    ref_out0, ref_resid0 = _reference(hidden_states, None, gamma, beta, w_mix, b_mix)
    assert jnp.allclose(out0, ref_out0, atol=3e-2, rtol=3e-2)
    assert jnp.allclose(resid0, ref_resid0, atol=1e-5, rtol=1e-5)

    print("KERNEL_OK")
</pallas_src>

<mosaic_0001>
module attributes {stable_mosaic.version = 11 : i64} {
  func.func @kernel(%arg0: i32, %arg1: i32, %arg2: memref<8x128xf32, #tpu.memory_space<vmem>>, %arg3: memref<8x128xf32, #tpu.memory_space<vmem>>, %arg4: memref<1x128xf32, #tpu.memory_space<vmem>>, %arg5: memref<1x128xf32, #tpu.memory_space<vmem>>, %arg6: memref<128x128xbf16, #tpu.memory_space<vmem>>, %arg7: memref<1x128xf32, #tpu.memory_space<vmem>>, %arg8: memref<8x128xf32, #tpu.memory_space<vmem>>, %arg9: memref<8x128xf32, #tpu.memory_space<vmem>>, %arg10: memref<8x128xbf16, #tpu.memory_space<vmem>>) attributes {dimension_semantics = [#tpu.dimension_semantics<parallel>, #tpu.dimension_semantics<arbitrary>], iteration_bounds = array<i64: 2, 1>, scalar_prefetch = 0 : i64, scratch_operands = 1 : i64, tpu.core_type = #tpu.core_type<tc>, window_params = [{transform_indices = @transform_0, window_bounds = array<i64: 8, 128>}, {transform_indices = @transform_1, window_bounds = array<i64: 8, 128>}, {pipeline_mode = #tpu.pipeline_mode<synchronous>, transform_indices = @transform_2, window_bounds = array<i64: 1, 128>}, {pipeline_mode = #tpu.pipeline_mode<synchronous>, transform_indices = @transform_3, window_bounds = array<i64: 1, 128>}, {transform_indices = @transform_4, window_bounds = array<i64: 128, 128>}, {transform_indices = @transform_5, window_bounds = array<i64: 1, 128>}, {transform_indices = @transform_6, window_bounds = array<i64: 8, 128>}, {transform_indices = @transform_7, window_bounds = array<i64: 8, 128>}]} {
    %c0_i32 = arith.constant 0 : i32
    %0 = arith.cmpi eq, %arg1, %c0_i32 : i32
    %1 = arith.extui %0 : i1 to i32
    %c0_i32_0 = arith.constant 0 : i32
    %2 = arith.cmpi ne, %1, %c0_i32_0 : i32
    scf.if %2 {
      %c0_8 = arith.constant 0 : index
      %c0_9 = arith.constant 0 : index
      %10 = vector.load %arg2[%c0_8, %c0_9] : memref<8x128xf32, #tpu.memory_space<vmem>>, vector<8x128xf32>
      %c0_10 = arith.constant 0 : index
      %c0_11 = arith.constant 0 : index
      %11 = vector.load %arg3[%c0_10, %c0_11] : memref<8x128xf32, #tpu.memory_space<vmem>>, vector<8x128xf32>
      %12 = arith.addf %10, %11 : vector<8x128xf32>
      %c0_12 = arith.constant 0 : index
      %c0_13 = arith.constant 0 : index
      %13 = vector.load %arg9[%c0_12, %c0_13] : memref<8x128xf32, #tpu.memory_space<vmem>>, vector<8x128xf32>
      tpu.vector_store %arg9[%c0_12, %c0_13], %12 {strides = array<i32>} : memref<8x128xf32, #tpu.memory_space<vmem>>, vector<8x128xf32>,
      %cst_14 = arith.constant dense<0.000000e+00> : vector<8xf32>
      %14 = vector.multi_reduction <add>, %12, %cst_14 [1] : vector<8x128xf32> to vector<8xf32>
      %15 = vector.shape_cast %14 : vector<8xf32> to vector<8x1xf32>
      %cst_15 = arith.constant 3.125000e-02 : f32
      %16 = vector.broadcast %cst_15 : f32 to vector<8x1xf32>
      %17 = arith.mulf %15, %16 : vector<8x1xf32>
      %18 = vector.broadcast %17 : vector<8x1xf32> to vector<8x128xf32>
      %19 = arith.subf %12, %18 : vector<8x128xf32>
      %20 = tpu.iota {dimensions = array<i32: 1>} : vector<8x128xi32>
      %c32_i32 = arith.constant 32 : i32
      %21 = vector.broadcast %c32_i32 : i32 to vector<8x128xi32>
      %22 = arith.cmpi slt, %20, %21 : vector<8x128xi32>
      %cst_16 = arith.constant 0.000000e+00 : f32
      %23 = vector.broadcast %cst_16 : f32 to vector<8x128xf32>
      %24 = arith.select %22, %19, %23 : vector<8x128xi1>, vector<8x128xf32>
      %25 = arith.mulf %24, %24 : vector<8x128xf32>
      %cst_17 = arith.constant dense<0.000000e+00> : vector<8xf32>
      %26 = vector.multi_reduction <add>, %25, %cst_17 [1] : vector<8x128xf32> to vector<8xf32>
      %27 = vector.shape_cast %26 : vector<8xf32> to vector<8x1xf32>
      %cst_18 = arith.constant 3.125000e-02 : f32
      %28 = vector.broadcast %cst_18 : f32 to vector<8x1xf32>
      %29 = arith.mulf %27, %28 : vector<8x1xf32>
      %cst_19 = arith.constant 9.99999974E-6 : f32
      %30 = vector.broadcast %cst_19 : f32 to vector<8x1xf32>
      %31 = arith.addf %29, %30 : vector<8x1xf32>
      %32 = math.rsqrt %31 : vector<8x1xf32>
      %33 = vector.broadcast %32 : vector<8x1xf32> to vector<8x128xf32>
      %34 = arith.mulf %24, %33 : vector<8x128xf32>
      %c0_20 = arith.constant 0 : index
      %c0_21 = arith.constant 0 : index
      %35 = vector.load %arg4[%c0_20, %c0_21] : memref<1x128xf32, #tpu.memory_space<vmem>>, vector<1x128xf32>
      %36 = vector.broadcast %35 : vector<1x128xf32> to vector<8x128xf32>
      %37 = arith.mulf %34, %36 : vector<8x128xf32>
      %c0_22 = arith.constant 0 : index
      %c0_23 = arith.constant 0 : index
      %38 = vector.load %arg5[%c0_22, %c0_23] : memref<1x128xf32, #tpu.memory_space<vmem>>, vector<1x128xf32>
      %39 = vector.broadcast %38 : vector<1x128xf32> to vector<8x128xf32>
      %40 = arith.addf %37, %39 : vector<8x128xf32>
      %41 = arith.truncf %40 : vector<8x128xf32> to vector<8x128xbf16>
      %c0_24 = arith.constant 0 : index
      %c0_25 = arith.constant 0 : index
      %42 = vector.load %arg10[%c0_24, %c0_25] : memref<8x128xbf16, #tpu.memory_space<vmem>>, vector<8x128xbf16>
      tpu.vector_store %arg10[%c0_24, %c0_25], %41 {strides = array<i32>} : memref<8x128xbf16, #tpu.memory_space<vmem>>, vector<8x128xbf16>,
    } else {
    }
    %c0 = arith.constant 0 : index
    %c0_1 = arith.constant 0 : index
    %3 = vector.load %arg10[%c0, %c0_1] : memref<8x128xbf16, #tpu.memory_space<vmem>>, vector<8x128xbf16>
    %c0_2 = arith.constant 0 : index
    %c0_3 = arith.constant 0 : index
    %4 = vector.load %arg6[%c0_2, %c0_3] : memref<128x128xbf16, #tpu.memory_space<vmem>>, vector<128x128xbf16>
    %cst = arith.constant dense<0.000000e+00> : vector<8x128xf32>
    %5 = tpu.matmul %3, %4, %cst {dimension_numbers = #tpu.dot_dimension_numbers<[1], [0], [0], [1], [0, 0, 1, 1], [], []>} : vector<8x128xbf16>, vector<128x128xbf16>, vector<8x128xf32> -> vector<8x128xf32>
    %c0_4 = arith.constant 0 : index
    %c0_5 = arith.constant 0 : index
    %6 = vector.load %arg7[%c0_4, %c0_5] : memref<1x128xf32, #tpu.memory_space<vmem>>, vector<1x128xf32>
    %7 = vector.broadcast %6 : vector<1x128xf32> to vector<8x128xf32>
    %8 = arith.addf %5, %7 : vector<8x128xf32>
    %c0_6 = arith.constant 0 : index
    %c0_7 = arith.constant 0 : index
    %9 = vector.load %arg8[%c0_6, %c0_7] : memref<8x128xf32, #tpu.memory_space<vmem>>, vector<8x128xf32>
    tpu.vector_store %arg8[%c0_6, %c0_7], %8 {strides = array<i32>} : memref<8x128xf32, #tpu.memory_space<vmem>>, vector<8x128xf32>,
    return
  }
  func.func @transform_0(%arg0: i32, %arg1: i32) -> (i32, i32) {
    %c0_i32 = arith.constant 0 : i32
    %c0_i32_0 = arith.constant 0 : i32
    return %arg0, %c0_i32 : i32, i32
  }
  func.func @transform_1(%arg0: i32, %arg1: i32) -> (i32, i32) {
    %c0_i32 = arith.constant 0 : i32
    %c0_i32_0 = arith.constant 0 : i32
    return %arg0, %c0_i32 : i32, i32
  }
  func.func @transform_2(%arg0: i32, %arg1: i32) -> (i32, i32) {
    %c0_i32 = arith.constant 0 : i32
    %c0_i32_0 = arith.constant 0 : i32
    %c0_i32_1 = arith.constant 0 : i32
    return %c0_i32, %c0_i32_0 : i32, i32
  }
  func.func @transform_3(%arg0: i32, %arg1: i32) -> (i32, i32) {
    %c0_i32 = arith.constant 0 : i32
    %c0_i32_0 = arith.constant 0 : i32
    %c0_i32_1 = arith.constant 0 : i32
    return %c0_i32, %c0_i32_0 : i32, i32
  }
  func.func @transform_4(%arg0: i32, %arg1: i32) -> (i32, i32) {
    %c0_i32 = arith.constant 0 : i32
    %c0_i32_0 = arith.constant 0 : i32
    return %c0_i32, %arg1 : i32, i32
  }
  func.func @transform_5(%arg0: i32, %arg1: i32) -> (i32, i32) {
    %c0_i32 = arith.constant 0 : i32
    %c0_i32_0 = arith.constant 0 : i32
    return %c0_i32, %arg1 : i32, i32
  }
  func.func @transform_6(%arg0: i32, %arg1: i32) -> (i32, i32) {
    %c0_i32 = arith.constant 0 : i32
    return %arg0, %arg1 : i32, i32
  }
  func.func @transform_7(%arg0: i32, %arg1: i32) -> (i32, i32) {
    %c0_i32 = arith.constant 0 : i32
    %c0_i32_0 = arith.constant 0 : i32
    return %arg0, %c0_i32 : i32, i32
  }
}

</mosaic_0001>

<bundles_post_ra>
// kernel: _block_forward_impl.1
= control target key start
LH: loop header
LB: loop body
LE: loop exit
PB: predicated region body
PF: predicated region fallthrough
CT: control target
= control target key end

     0   :  { %s805_s24 = smov 0   ;;  %s807_s25 = smov 0   ;;  %s883_s0 = inlined_call_operand.vmem [shape: f32[16,128], index: 0, kind: input, shape index: {}]   ;;  %s884_s1 = inlined_call_operand.vmem [shape: f32[16,128], index: 1, kind: input, shape index: {}]   ;;  %s885_s2 = inlined_call_operand.vmem [shape: f32[1,128], index: 2, kind: input, shape index: {}]   ;;  %s886_s3 = inlined_call_operand.vmem [shape: f32[1,128], index: 3, kind: input, shape index: {}]   ;;  %s887_s4 = inlined_call_operand.vmem [shape: bf16[128,128], index: 4, kind: input, shape index: {}]   ;;  %s888_s5 = inlined_call_operand.vmem [shape: f32[1,128], index: 5, kind: input, shape index: {}]   ;;  %s889_s6 = inlined_call_operand.vmem [shape: f32[16,128], index: 6, kind: output, shape index: {0}]   ;;  %s890_s7 = inlined_call_operand.vmem [shape: f32[16,128], index: 7, kind: output, shape index: {1}]  }
   0x1   :  { %s809_s26 = smov 0  }
   0x2 LB: > { %s30_s27 = sadd.s32 1, %s757_s25  ;;  %p656_p0 = scmp.ge.s32.totalorder %s761_s26, 1  ;;  %s761_s26 = sphi %s809_s26, %s18_s26   ;;  %s757_s25 = sphi %s807_s25, %s892_s25   ;;  %s753_s24 = sphi %s805_s24, %s891_s24  }
   0x3   : > { %p32_p1 = scmp.ge.s32.totalorder %s30_s27, 2  ;;  %p279_p2 = scmp.lt.s32.totalorder %s761_s26, 3 }
   0x5   : > { %s894_s27 = smov (%p32_p1, %s30_s27), 0  ;;  %p280_p3 = pnand %p656_p0, %p279_p2 }
   0x6   : > { %p327_p4 = scmp.lt.s32.totalorder (!%p280_p3), %s753_s24, 1  ;;  %v763_v3 = vmov (!%p280_p3), 0.0   ;;  %v366_v4 = vlaneseq (!%p280_p3)  ;;  %v729_v11 = vld [vmem:[%s887_s4] sm:$0xff] (!%p280_p3)   ;;  %v730_v12 = vld [vmem:[%s887_s4 + $0x8] sm:$0xff] (!%p280_p3)   ;;  %v731_v13 = vld [vmem:[%s887_s4 + $0x10] sm:$0xff] (!%p280_p3)   ;;  %vm764_vm1 = vmmov (!%p280_p3), 0  }
   0x7   : > { %283 = sbr.rel (%p280_p3) target bundleno = 558 (0x22e), region = 44  ;;  %683 = vmatprep.subr.bf16.mxu0 (!%p280_p3), %v763_v3  ;;  %v732_v14 = vld [vmem:[%s887_s4 + $0x18] sm:$0xff] (!%p280_p3)   ;;  %v733_v15 = vld [vmem:[%s887_s4 + $0x20] sm:$0xff] (!%p280_p3)   ;;  %v734_v16 = vld [vmem:[%s887_s4 + $0x28] sm:$0xff] (!%p280_p3)   ;;  %699 = vmatprep.mubr.msk.bf16.mxu0 (!%p280_p3), %vm764_vm1, %v763_v3 }
   0x8   : > { %v367_v5 = vand.u32 (!%p280_p3), 127, %v366_v4  ;;  %684 = vmatpush3.bf16.msra.mxu0 (!%p280_p3), %v729_v11  ;;  %v735_v17 = vld [vmem:[%s887_s4 + $0x30] sm:$0xff] (!%p280_p3)   ;;  %v736_v18 = vld [vmem:[%s887_s4 + $0x38] sm:$0xff] (!%p280_p3)   ;;  %v661_v23 = vld [vmem:[%s885_s2] ss:$0 sm:$0xff] (!%p280_p3) }
   0x9   : > { %685 = vmatprep.subr.bf16.mxu0 (!%p280_p3), %v763_v3  ;;  %v662_v25 = vld [vmem:[%s886_s3] ss:$0 sm:$0xff] (!%p280_p3) }
   0xa   : > { %vm368_vm0 = vcmp.lt.s32.totalorder (!%p280_p3), %v367_v5, 32  ;;  %v663_v30 = vld [vmem:[%s888_s5] ss:$0 sm:$0xff] (!%p280_p3) }
   0xc   : > { %686 = vmatpush3.bf16.msra.mxu0 (!%p280_p3), %v730_v12 }
   0xd   : > { %687 = vmatprep.subr.bf16.mxu0 (!%p280_p3), %v763_v3 }
   0xe   : > { %s896_s24 = smov (!%p327_p4, %s753_s24), 1 }
   0xf   : > { %s823_s28 = sshll.u32 %s896_s24, 3 }
  0x10   : > { %s330_s8 = scalar_lea.vmem %s883_s0, %s823_s28  ;;  %s334_s11 = scalar_lea.vmem %s884_s1, %s823_s28  ;;  %688 = vmatpush3.bf16.msra.mxu0 %v731_v13 }
  0x11   : > { %s352_s14 = scalar_lea.vmem %s890_s7, %s823_s28  ;;  %v358_v0 = vld [vmem:[%s330_s8] sm:$0xff]  ;;  %689 = vmatprep.subr.bf16.mxu0 %v763_v3  ;;  %s348_s20 = scalar_lea.vmem %s889_s6, %s823_s28 }
  0x12   : > { %v359_v1 = vld [vmem:[%s334_s11] sm:$0xff] }
  0x13   : > { %v360_v2 = vadd.f32 %v359_v1, %v358_v0 }
  0x14   : > { %690 = vmatpush3.bf16.msra.mxu0 %v732_v14 }
  0x15   : > { %362 = vadd.xlane.f32.xlu0 %v360_v2  ;;  %361 = vst [vmem:[%s352_s14] sm:$0xff] %v360_v2  ;;  %691 = vmatprep.subr.bf16.mxu0 %v763_v3 }
  0x18   : > { %692 = vmatpush3.bf16.msra.mxu0 %v733_v15 }
  0x19   : > { %693 = vmatprep.subr.bf16.mxu0 %v763_v3 }
  0x1c   : > { %694 = vmatpush3.bf16.msra.mxu0 %v734_v16 }
  0x1d   : > { %695 = vmatprep.subr.bf16.mxu0 %v763_v3 }
  0x20   : > { %696 = vmatpush3.bf16.msra.mxu0 %v735_v17 }
  0x21   : > { %697 = vmatprep.subr.bf16.mxu0 %v763_v3 }
  0x24   : > { %698 = vmatpush3.bf16.msra.mxu0 %v736_v18 }
  0xa2   : > { %v363_v6 = vpop.xlane.xlu0 %362 }
  0xa3   : > { %v364_v7 = vmul.f32 0.03125, %v363_v6 }
  0xa5   : > { %v365_v8 = vsub.f32 %v360_v2, %v364_v7 }
  0xa7   : > { %v369_v9 = vsel %vm368_vm0, %v365_v8, 0.0 }
  0xa8   : > { %v370_v10 = vmul.f32 %v369_v9, %v369_v9 }
  0xaa   : > { %371 = vadd.xlane.f32.xlu0 %v370_v10 }
 0x137   : > { %v372_v19 = vpop.xlane.xlu0 %371 }
 0x138   : > { %v373_v20 = vmul.f32 0.03125, %v372_v19 }
 0x13a   : > { %v374_v21 = vadd.f32 1e-05, %v373_v20 }
 0x13c   : > { %737 = vrsqrt.f32 %v374_v21 }
 0x146   : > { %v738_v22 = vpop.eup %737 }
 0x147   : > { %v376_v24 = vmul.f32 %v738_v22, %v369_v9 }
 0x149   : > { %v384_v26 = vmul.f32 %v661_v23, %v376_v24 }
 0x14b   : > { %v392_v27 = vadd.f32 %v662_v25, %v384_v26 }
 0x14d   : > { %v393_v28 = vpack.c.bf16 %v392_v27, %v392_v27 }
 0x14f   : > { %394 = vst [vmem:[#allocation2] sm:$0xf] %v393_v28 }
 0x156   : > { %v395_v29 = vld [vmem:[#allocation2] sm:$0xf] }
 0x157   : > { %700 = vmatmul.mubr.bf16.vlgmr.msra.gmra.mrb[0].mxu0 %v395_v29 }
 0x22a   : > { %v501_v31 = vpop.f32.mrb[0].mxu0 }
 0x22b   : > { %v502_v32 = vadd.f32 %v663_v30, %v501_v31  ;;  %v701_v33 = vpop.f32.mrb[1].mxu0 }
 0x22c   : > { %v504_v34 = vpop.f32.mrb[2].mxu0 }
 0x22d   : > { %507 = vst [vmem:[%s348_s20] sm:$0xff] %v502_v32  ;;  %v702_v35 = vpop.f32.mrb[3].mxu0 }
 0x22e PF: > { %s18_s26 = sadd.s32 1, %s761_s26   ;;  %s891_s24 = smov %s757_s25 }
 0x22f   : > { %p15_p5 = scmp.ge.s32.totalorder %s18_s26, 4   ;;  %s892_s25 = smov %s894_s27 }
 0x231   :  { %17 = sbr.rel (!%p15_p5) target bundleno = 2 (0x2), region = 99 }

</bundles_post_ra>
